<compile_context>
chip_gen: v7x
topology: tpu7x:2x2x1
jax: 0.10.0
libtpu: 0.0.40
codegen_flags: <defaults>
</compile_context>

<pallas_src>
import numpy as np
import jax
import jax.numpy as jnp
from jax.experimental import pallas as pl
from jax.experimental.pallas import tpu as pltpu

# ----------------------------- configuration --------------------------------
PATCH = 2
WINDOW = (7, 7, 7)
FEATURE_SIZE = 24
DEPTHS = (2, 2, 2, 2)
NUM_HEADS = (3, 6, 12, 24)
NUM_MODALITIES = 5
IN_CHANNELS = 1
OUT_CHANNELS = 16 * FEATURE_SIZE      # channel dim of deepest swin feature (384)
BATCH = 2
IMG = 8                               # small cubic volume, divisible by patch


def _ru(x, m):
    return ((x + m - 1) // m) * m


# ----------------------------- in-kernel math --------------------------------

def _erf(x):
    # Abramowitz & Stegun 7.1.26 rational approximation; |abs err| < 1.5e-7,
    # i.e. numerically equivalent to exact erf-GELU at f32 precision.
    # TODO(synk): lax.erf has no guaranteed Mosaic lowering, hence the approx.
    ax = jnp.abs(x)
    t = 1.0 / (1.0 + 0.3275911 * ax)
    poly = t * (0.254829592 + t * (-0.284496736 + t * (1.421413741
               + t * (-1.453152027 + t * 1.061405429))))
    y = 1.0 - poly * jnp.exp(-(ax * ax))
    return jnp.where(x >= 0, y, -y)


def _gelu(x):
    return 0.5 * x * (1.0 + _erf(x * 0.7071067811865476))


# =============================== Pallas kernels ==============================

def fused_matmul(x, w, b=None, *, gamma=None, beta=None, act=None,
                 residual=None, out_dtype=jnp.float32, tm_max=512):
    """y = act(LN_opt(x) @ w + b) (+ residual).

    x: [M, K] activations; w: [K, N] (bf16 weights, pre-cast at init);
    b: [N] or None; gamma/beta: [K] LayerNorm affine or None (eps=1e-5);
    act: None | 'gelu'; residual: [M, N] or None.
    Blocks use the full K/N extents (full-dim rule) so there is no padding, no
    K-loop and no accumulator scratch; the grid only tiles rows.  LN/epilogue
    math runs in f32, the dot runs in bf16 with f32 accumulation.
    """
    M, K = x.shape
    N = w.shape[1]
    has_ln = gamma is not None
    has_res = residual is not None
    if b is None:
        b = jnp.zeros((N,), jnp.float32)

    tm = M if M <= tm_max else tm_max
    Mp = _ru(M, tm)
    x_in = x if Mp == M else jnp.pad(x, ((0, Mp - M), (0, 0)))
    res_in = None
    if has_res:
        res_in = residual if Mp == M else jnp.pad(residual, ((0, Mp - M), (0, 0)))

    def kernel(*refs):
        p = 0
        x_ref = refs[p]; p += 1
        if has_ln:
            g_ref = refs[p]; be_ref = refs[p + 1]; p += 2
        w_ref = refs[p]; bias_ref = refs[p + 1]; p += 2
        if has_res:
            r_ref = refs[p]; p += 1
        o_ref = refs[p]

        h = x_ref[...]
        if has_ln:
            h = h.astype(jnp.float32)
            mu = jnp.mean(h, axis=-1, keepdims=True)
            var = jnp.mean(jnp.square(h - mu), axis=-1, keepdims=True)
            h = (h - mu) * jax.lax.rsqrt(var + 1e-5)
            h = h * g_ref[...] + be_ref[...]
        y = jnp.dot(h.astype(jnp.bfloat16), w_ref[...],
                    preferred_element_type=jnp.float32)
        y = y + bias_ref[...]
        if act == "gelu":
            y = _gelu(y)
        if has_res:
            y = y + r_ref[...].astype(jnp.float32)
        o_ref[...] = y.astype(o_ref.dtype)

    in_specs = [pl.BlockSpec((tm, K), lambda i: (i, 0))]
    inputs = [x_in]
    if has_ln:
        in_specs += [pl.BlockSpec((1, K), lambda i: (0, 0)),
                     pl.BlockSpec((1, K), lambda i: (0, 0))]
        inputs += [gamma.astype(jnp.float32).reshape(1, K),
                   beta.astype(jnp.float32).reshape(1, K)]
    in_specs += [pl.BlockSpec((K, N), lambda i: (0, 0)),
                 pl.BlockSpec((1, N), lambda i: (0, 0))]
    inputs += [w.astype(jnp.bfloat16), b.astype(jnp.float32).reshape(1, N)]
    if has_res:
        in_specs += [pl.BlockSpec((tm, N), lambda i: (i, 0))]
        inputs += [res_in]

    out = pl.pallas_call(
        kernel,
        out_shape=jax.ShapeDtypeStruct((Mp, N), out_dtype),
        grid=(Mp // tm,),
        in_specs=in_specs,
        out_specs=pl.BlockSpec((tm, N), lambda i: (i, 0)),
        compiler_params=pltpu.CompilerParams(
            dimension_semantics=("parallel",)),
    )(*inputs)
    return out[:M] if Mp != M else out


def layer_norm(x2d, gamma, beta, tm_max=1024):
    """Row-wise LayerNorm over the channel (last) axis, eps=1e-5 (full-row blocks)."""
    M, C = x2d.shape
    tm = M if M <= tm_max else tm_max
    Mp = _ru(M, tm)
    x_in = x2d if Mp == M else jnp.pad(x2d, ((0, Mp - M), (0, 0)))

    def kernel(x_ref, g_ref, b_ref, o_ref):
        h = x_ref[...].astype(jnp.float32)
        mu = jnp.mean(h, axis=-1, keepdims=True)
        var = jnp.mean(jnp.square(h - mu), axis=-1, keepdims=True)
        o_ref[...] = ((h - mu) * jax.lax.rsqrt(var + 1e-5)
                      * g_ref[...] + b_ref[...]).astype(o_ref.dtype)

    out = pl.pallas_call(
        kernel,
        out_shape=jax.ShapeDtypeStruct((Mp, C), jnp.float32),
        grid=(Mp // tm,),
        in_specs=[pl.BlockSpec((tm, C), lambda i: (i, 0)),
                  pl.BlockSpec((1, C), lambda i: (0, 0)),
                  pl.BlockSpec((1, C), lambda i: (0, 0))],
        out_specs=pl.BlockSpec((tm, C), lambda i: (i, 0)),
        compiler_params=pltpu.CompilerParams(
            dimension_semantics=("parallel",)),
    )(x_in, gamma.astype(jnp.float32).reshape(1, C),
      beta.astype(jnp.float32).reshape(1, C))
    return out[:M] if Mp != M else out


def window_attention_core(q, k, v, bias, scale):
    """q,k,v: [BW, H, N, Dh] (bf16); bias: [NB, H, N, N] f32 with NB==1 (shared
    relative-position bias) or NB==nw (shift mask folded in).  Returns f32
    [BW, H, N, Dh].  Windows are batched per grid step; softmax math is f32."""
    BW, H, N, Dh = q.shape
    NB = bias.shape[0]
    if NB == 1:
        G = 1
        for g in range(1, min(BW, 8) + 1):      # largest divisor of BW <= 8
            if BW % g == 0:
                G = g
        bias_map = lambda i: (0, 0, 0, 0)
    else:                                        # per-window shift mask
        G = 1
        bias_map = lambda i: (i % NB, 0, 0, 0)

    def kernel(q_ref, k_ref, v_ref, b_ref, o_ref):
        bias_blk = b_ref[0]                      # (H, N, N) f32
        for g in range(G):                       # static unroll
            qg = q_ref[g].astype(jnp.bfloat16)
            kg = k_ref[g].astype(jnp.bfloat16)
            vg = v_ref[g].astype(jnp.bfloat16)
            s = jnp.einsum('hqd,hkd->hqk', qg, kg,
                           preferred_element_type=jnp.float32)
            s = s * scale + bias_blk
            s = s - jnp.max(s, axis=-1, keepdims=True)
            e = jnp.exp(s)
            p = e * pl.reciprocal(jnp.sum(e, axis=-1, keepdims=True), approx=True)
            o = jnp.einsum('hqk,hkd->hqd', p.astype(jnp.bfloat16), vg,
                           preferred_element_type=jnp.float32)
            o_ref[g] = o.astype(o_ref.dtype)

    return pl.pallas_call(
        kernel,
        out_shape=jax.ShapeDtypeStruct((BW, H, N, Dh), jnp.float32),
        grid=(BW // G,),
        in_specs=[
            pl.BlockSpec((G, H, N, Dh), lambda i: (i, 0, 0, 0)),
            pl.BlockSpec((G, H, N, Dh), lambda i: (i, 0, 0, 0)),
            pl.BlockSpec((G, H, N, Dh), lambda i: (i, 0, 0, 0)),
            pl.BlockSpec((1, H, N, N), bias_map),
        ],
        out_specs=pl.BlockSpec((G, H, N, Dh), lambda i: (i, 0, 0, 0)),
        compiler_params=pltpu.CompilerParams(
            dimension_semantics=("parallel",)),
    )(q, k, v, bias)


# ============================ Swin building blocks ===========================

def _rel_pos_index_3d(ws):
    coords = np.stack(np.meshgrid(np.arange(ws[0]), np.arange(ws[1]),
                                  np.arange(ws[2]), indexing="ij"))
    cf = coords.reshape(3, -1)
    rel = (cf[:, :, None] - cf[:, None, :]).transpose(1, 2, 0).astype(np.int64)
    rel[:, :, 0] += ws[0] - 1
    rel[:, :, 1] += ws[1] - 1
    rel[:, :, 2] += ws[2] - 1
    rel[:, :, 0] *= (2 * ws[1] - 1) * (2 * ws[2] - 1)
    rel[:, :, 1] *= 2 * ws[2] - 1
    return rel.sum(-1)                # (343, 343)


REL_POS_INDEX = _rel_pos_index_3d(WINDOW)


def get_window_size(x_size, window_size, shift_size):
    use_ws, use_ss = list(window_size), list(shift_size)
    for i in range(len(x_size)):
        if x_size[i] <= window_size[i]:
            use_ws[i] = x_size[i]
            use_ss[i] = 0
    return tuple(use_ws), tuple(use_ss)


def window_partition(x, ws):
    B, D, H, W, C = x.shape
    x = x.reshape(B, D // ws[0], ws[0], H // ws[1], ws[1], W // ws[2], ws[2], C)
    x = jnp.transpose(x, (0, 1, 3, 5, 2, 4, 6, 7))
    return x.reshape(-1, ws[0] * ws[1] * ws[2], C)


def window_reverse(wins, ws, dims):
    B, D, H, W = dims
    x = wins.reshape(B, D // ws[0], H // ws[1], W // ws[2],
                     ws[0], ws[1], ws[2], -1)
    x = jnp.transpose(x, (0, 1, 4, 2, 5, 3, 6, 7))
    return x.reshape(B, D, H, W, -1)


def compute_mask(dims, ws, ss):
    # NOTE: assumes all components of ss are > 0 when called (true whenever the
    # shifted path is taken with un-clamped windows); clamped dims zero the
    # shift and this function is then never reached.
    D, H, W = dims
    img_mask = np.zeros((1, D, H, W, 1), np.float32)
    cnt = 0
    for d in (slice(-ws[0]), slice(-ws[0], -ss[0]), slice(-ss[0], None)):
        for h in (slice(-ws[1]), slice(-ws[1], -ss[1]), slice(-ss[1], None)):
            for w in (slice(-ws[2]), slice(-ws[2], -ss[2]), slice(-ss[2], None)):
                img_mask[:, d, h, w, :] = cnt
                cnt += 1
    m = img_mask.reshape(1, D // ws[0], ws[0], H // ws[1], ws[1],
                         W // ws[2], ws[2], 1)
    m = m.transpose(0, 1, 3, 5, 2, 4, 6, 7).reshape(-1, ws[0] * ws[1] * ws[2])
    attn_mask = m[:, None, :] - m[:, :, None]
    attn_mask = np.where(attn_mask != 0, -100.0, 0.0).astype(np.float32)
    return jnp.asarray(attn_mask)     # (nw, n, n)


def swin_block(x, p, num_heads, shift_size):
    B, D, H, W, C = x.shape
    ws, ss = get_window_size((D, H, W), WINDOW, shift_size)
    pad_d = (ws[0] - D % ws[0]) % ws[0]
    pad_h = (ws[1] - H % ws[1]) % ws[1]
    pad_w = (ws[2] - W % ws[2]) % ws[2]
    shifted = any(s > 0 for s in ss)
    padded = bool(pad_d or pad_h or pad_w)

    x_rows = x.reshape(-1, C)
    N = ws[0] * ws[1] * ws[2]
    dh = C // num_heads
    scale = dh ** -0.5

    # relative position bias (H, N, N), MONAI-style [:N,:N] truncation
    idx = REL_POS_INDEX[:N, :N].reshape(-1)
    rel = p["attn"]["rel_table"][idx].reshape(N, N, num_heads)
    rel = jnp.transpose(rel, (2, 0, 1)).astype(jnp.float32)

    if not shifted and not padded:
        # LN fused into the qkv projection on un-partitioned token rows
        # (the per-token linear commutes with the window permutation).
        qkv = fused_matmul(x_rows, p["attn"]["qkv_w"], p["attn"]["qkv_b"],
                           gamma=p["norm1_g"], beta=p["norm1_b"],
                           out_dtype=jnp.bfloat16)
        qkv_w = window_partition(qkv.reshape(B, D, H, W, 3 * C), ws)  # (BW,N,3C)
        Dp, Hp, Wp = D, H, W
        bias = rel[None]                                              # (1,H,N,N)
    else:
        # general (padded / shifted) path — not exercised at these sizes
        h = layer_norm(x_rows, p["norm1_g"], p["norm1_b"]).reshape(B, D, H, W, C)
        h = jnp.pad(h, ((0, 0), (0, pad_d), (0, pad_h), (0, pad_w), (0, 0)))
        _, Dp, Hp, Wp, _ = h.shape
        if shifted:
            h = jnp.roll(h, shift=(-ss[0], -ss[1], -ss[2]), axis=(1, 2, 3))
            mask = compute_mask((Dp, Hp, Wp), ws, ss)
            bias = rel[None] + mask[:, None, :, :]                    # (nw,H,N,N)
        else:
            bias = rel[None]
        hw = window_partition(h, ws)
        qkv = fused_matmul(hw.reshape(-1, C), p["attn"]["qkv_w"],
                           p["attn"]["qkv_b"], out_dtype=jnp.bfloat16)
        qkv_w = qkv.reshape(-1, N, 3 * C)

    BW = qkv_w.shape[0]
    qkv_w = qkv_w.reshape(BW, N, 3, num_heads, dh)
    qkv_w = jnp.transpose(qkv_w, (2, 0, 3, 1, 4))       # (3, BW, H, N, dh)
    attn = window_attention_core(qkv_w[0], qkv_w[1], qkv_w[2], bias, scale)
    attn = jnp.transpose(attn, (0, 2, 1, 3)).reshape(BW, N, C)

    aw = window_reverse(attn, ws, (B, Dp, Hp, Wp))
    if shifted:
        aw = jnp.roll(aw, shift=ss, axis=(1, 2, 3))
    aw = aw[:, :D, :H, :W, :]
    # attention output projection fused with the residual add (drop_path = id)
    x1 = fused_matmul(aw.reshape(-1, C), p["attn"]["proj_w"], p["attn"]["proj_b"],
                      residual=x_rows)

    # MLP: LN -> fc1 -> GELU fused; fc2 + residual fused
    h2 = fused_matmul(x1, p["fc1_w"], p["fc1_b"],
                      gamma=p["norm2_g"], beta=p["norm2_b"],
                      act="gelu", out_dtype=jnp.bfloat16)
    x2 = fused_matmul(h2, p["fc2_w"], p["fc2_b"], residual=x1)
    return x2.reshape(B, D, H, W, C)


def patch_merging(x, p):
    """MONAI v0.9 `PatchMerging` (3-D), including its duplicated-slice ordering."""
    B, D, H, W, C = x.shape
    if (D % 2) or (H % 2) or (W % 2):
        x = jnp.pad(x, ((0, 0), (0, D % 2), (0, H % 2), (0, W % 2), (0, 0)))
    offs = [(0, 0, 0), (1, 0, 0), (0, 1, 0), (0, 0, 1),
            (1, 0, 1), (0, 1, 0), (0, 0, 1), (1, 1, 1)]   # intentional MONAI parity
    parts = [x[:, i::2, j::2, k::2, :] for (i, j, k) in offs]
    x = jnp.concatenate(parts, axis=-1)
    B2, D2, H2, W2, C8 = x.shape
    h = fused_matmul(x.reshape(-1, C8), p["red_w"], None,
                     gamma=p["norm_g"], beta=p["norm_b"])   # LN + Linear(8C->2C)
    return h.reshape(B2, D2, H2, W2, 2 * C)


def patch_embed(x, p):
    """Conv3d(k=2, s=2) as an unfold + fused Pallas matmul. x: [B, D, H, W, Cin]."""
    B, D, H, W, Cin = x.shape
    pd = (PATCH - D % PATCH) % PATCH
    ph = (PATCH - H % PATCH) % PATCH
    pw = (PATCH - W % PATCH) % PATCH
    if pd or ph or pw:
        x = jnp.pad(x, ((0, 0), (0, pd), (0, ph), (0, pw), (0, 0)))
        B, D, H, W, Cin = x.shape
    x = x.reshape(B, D // 2, 2, H // 2, 2, W // 2, 2, Cin)
    x = jnp.transpose(x, (0, 1, 3, 5, 7, 2, 4, 6))
    x = x.reshape(B * (D // 2) * (H // 2) * (W // 2), Cin * 8)
    h = fused_matmul(x, p["w"], p["b"])
    return h.reshape(B, D // 2, H // 2, W // 2, -1)


def swin_transformer_last_feature(x_cl, params):
    """MONAI SwinTransformer forward; returns the normalized deepest feature
    (== feat[-1] of the reference), channels-last [B, d, h, w, 16*feature]."""
    feat = patch_embed(x_cl, params["patch_embed"])   # pos_drop = identity
    for s in range(4):
        stage = params["stages"][s]
        for bi, bp in enumerate(stage["blocks"]):
            shift = (0, 0, 0) if bi % 2 == 0 else tuple(w // 2 for w in WINDOW)
            feat = swin_block(feat, bp, NUM_HEADS[s], shift)
        feat = patch_merging(feat, stage["downsample"])
    B, D, H, W, C = feat.shape
    out = layer_norm(feat.reshape(-1, C),
                     jnp.ones((C,), jnp.float32), jnp.zeros((C,), jnp.float32))
    return out.reshape(B, D, H, W, C)


def model_forward(x_list, params):
    """x_list: list of NUM_MODALITIES NCDHW tensors [B, Cin, D, H, W]."""
    features = []
    for i, x in enumerate(x_list):
        x_cl = jnp.transpose(x, (0, 2, 3, 4, 1))      # NCDHW -> channels-last
        f = swin_transformer_last_feature(x_cl, params["swin"][i])
        pooled = jnp.mean(f, axis=(1, 2, 3))          # AdaptiveAvgPool3d(1)+flatten
        features.append(pooled)
    fused = jnp.concatenate(features, axis=1)         # fusion_method == 'concat'
    fused = fused_matmul(fused, params["fusion_w"], params["fusion_b"])
    # classifier dropout (p=0.3) is identity in eval mode; both heads in one matmul
    cls_w = jnp.concatenate([params["cls1_w"], params["cls2_w"]], axis=1)
    cls_b = jnp.concatenate([params["cls1_b"], params["cls2_b"]], axis=0)
    out = fused_matmul(fused, cls_w, cls_b)
    return out[:, :2], out[:, 2:]


# ============================== parameter init ===============================

def init_params(key):
    counter = [0]

    def rnd(shape, scale=0.02, dtype=jnp.float32):
        counter[0] += 1
        k = jax.random.fold_in(key, counter[0])
        return (jax.random.normal(k, shape, jnp.float32) * scale).astype(dtype)

    def wmat(shape):
        # MXU weight matrices pre-cast to bf16 once, outside the forward pass
        return rnd(shape, dtype=jnp.bfloat16)

    def zeros(shape):
        return jnp.zeros(shape, jnp.float32)

    def ones(shape):
        return jnp.ones(shape, jnp.float32)

    def one_swin():
        p = {"patch_embed": {"w": wmat((IN_CHANNELS * PATCH ** 3, FEATURE_SIZE)),
                             "b": zeros((FEATURE_SIZE,))},
             "stages": []}
        for s in range(4):
            dim = FEATURE_SIZE * (2 ** s)
            heads = NUM_HEADS[s]
            hidden = int(dim * 4.0)
            blocks = []
            for _ in range(DEPTHS[s]):
                blocks.append({
                    "norm1_g": ones((dim,)), "norm1_b": zeros((dim,)),
                    "attn": {
                        "qkv_w": wmat((dim, 3 * dim)), "qkv_b": zeros((3 * dim,)),
                        "proj_w": wmat((dim, dim)), "proj_b": zeros((dim,)),
                        "rel_table": rnd(((2 * 7 - 1) ** 3, heads)),
                    },
                    "norm2_g": ones((dim,)), "norm2_b": zeros((dim,)),
                    "fc1_w": wmat((dim, hidden)), "fc1_b": zeros((hidden,)),
                    "fc2_w": wmat((hidden, dim)), "fc2_b": zeros((dim,)),
                })
            p["stages"].append({
                "blocks": blocks,
                "downsample": {"norm_g": ones((8 * dim,)),
                               "norm_b": zeros((8 * dim,)),
                               "red_w": wmat((8 * dim, 2 * dim))},
            })
        return p

    return {
        "swin": [one_swin() for _ in range(NUM_MODALITIES)],
        "fusion_w": wmat((OUT_CHANNELS * NUM_MODALITIES, OUT_CHANNELS)),
        "fusion_b": zeros((OUT_CHANNELS,)),
        "cls1_w": wmat((OUT_CHANNELS, 2)), "cls1_b": zeros((2,)),
        "cls2_w": wmat((OUT_CHANNELS, 2)), "cls2_b": zeros((2,)),
    }


# ==================================== main ===================================

if __name__ == "__main__":
    root = jax.random.PRNGKey(0)
    keys = jax.random.split(root, NUM_MODALITIES + 1)
    x_list = [jax.random.normal(keys[i], (BATCH, IN_CHANNELS, IMG, IMG, IMG),
                                jnp.float32) for i in range(NUM_MODALITIES)]
    params = init_params(keys[-1])

    out1, out2 = model_forward(x_list, params)
    jax.block_until_ready((out1, out2))
    assert out1.shape == (BATCH, 2) and out2.shape == (BATCH, 2)
    assert bool(jnp.all(jnp.isfinite(out1))) and bool(jnp.all(jnp.isfinite(out2)))
    print("KERNEL_OK")
</pallas_src>

<mosaic_0001>
module attributes {stable_mosaic.version = 11 : i64} {
  func.func @kernel(%arg0: i32, %arg1: memref<128x8xf32, #tpu.memory_space<vmem>>, %arg2: memref<8x24xbf16, #tpu.memory_space<vmem>>, %arg3: memref<1x24xf32, #tpu.memory_space<vmem>>, %arg4: memref<128x24xf32, #tpu.memory_space<vmem>>) attributes {dimension_semantics = [#tpu.dimension_semantics<parallel>], iteration_bounds = array<i64: 1>, scalar_prefetch = 0 : i64, scratch_operands = 0 : i64, tpu.core_type = #tpu.core_type<tc>, window_params = [{transform_indices = @transform_0, window_bounds = array<i64: 128, 8>}, {pipeline_mode = #tpu.pipeline_mode<synchronous>, transform_indices = @transform_1, window_bounds = array<i64: 8, 24>}, {pipeline_mode = #tpu.pipeline_mode<synchronous>, transform_indices = @transform_2, window_bounds = array<i64: 1, 24>}, {transform_indices = @transform_3, window_bounds = array<i64: 128, 24>}]} {
    %c0 = arith.constant 0 : index
    %c0_0 = arith.constant 0 : index
    %0 = vector.load %arg1[%c0, %c0_0] : memref<128x8xf32, #tpu.memory_space<vmem>>, vector<128x8xf32>
    %1 = arith.truncf %0 : vector<128x8xf32> to vector<128x8xbf16>
    %c0_1 = arith.constant 0 : index
    %c0_2 = arith.constant 0 : index
    %2 = vector.load %arg2[%c0_1, %c0_2] : memref<8x24xbf16, #tpu.memory_space<vmem>>, vector<8x24xbf16>
    %cst = arith.constant dense<0.000000e+00> : vector<128x24xf32>
    %3 = tpu.matmul %1, %2, %cst {dimension_numbers = #tpu.dot_dimension_numbers<[1], [0], [0], [1], [0, 0, 1, 1], [], []>} : vector<128x8xbf16>, vector<8x24xbf16>, vector<128x24xf32> -> vector<128x24xf32>
    %c0_3 = arith.constant 0 : index
    %c0_4 = arith.constant 0 : index
    %4 = vector.load %arg3[%c0_3, %c0_4] : memref<1x24xf32, #tpu.memory_space<vmem>>, vector<1x24xf32>
    %5 = vector.broadcast %4 : vector<1x24xf32> to vector<128x24xf32>
    %6 = arith.addf %3, %5 : vector<128x24xf32>
    %c0_5 = arith.constant 0 : index
    %c0_6 = arith.constant 0 : index
    %7 = vector.load %arg4[%c0_5, %c0_6] : memref<128x24xf32, #tpu.memory_space<vmem>>, vector<128x24xf32>
    tpu.vector_store %arg4[%c0_5, %c0_6], %6 {strides = array<i32>} : memref<128x24xf32, #tpu.memory_space<vmem>>, vector<128x24xf32>,
    return
  }
  func.func @transform_0(%arg0: i32) -> (i32, i32) {
    %c0_i32 = arith.constant 0 : i32
    %c0_i32_0 = arith.constant 0 : i32
    return %arg0, %c0_i32 : i32, i32
  }
  func.func @transform_1(%arg0: i32) -> (i32, i32) {
    %c0_i32 = arith.constant 0 : i32
    %c0_i32_0 = arith.constant 0 : i32
    %c0_i32_1 = arith.constant 0 : i32
    return %c0_i32, %c0_i32_0 : i32, i32
  }
  func.func @transform_2(%arg0: i32) -> (i32, i32) {
    %c0_i32 = arith.constant 0 : i32
    %c0_i32_0 = arith.constant 0 : i32
    %c0_i32_1 = arith.constant 0 : i32
    return %c0_i32, %c0_i32_0 : i32, i32
  }
  func.func @transform_3(%arg0: i32) -> (i32, i32) {
    %c0_i32 = arith.constant 0 : i32
    %c0_i32_0 = arith.constant 0 : i32
    return %arg0, %c0_i32 : i32, i32
  }
}

</mosaic_0001>

<bundles_post_ra>
// kernel: tpu_custom_call.1
= control target key start
LH: loop header
LB: loop body
LE: loop exit
PB: predicated region body
PF: predicated region fallthrough
CT: control target
= control target key end

     0   :  { %vm72_vm0 = vcmask 1043456   ;;  %vm47_vm1 = vcmask 64512   ;;  %vm173_vm2 = vcmask 195584   ;;  %s380_s1 = inlined_call_operand.vmem [shape: bf16[8,24], index: 1, kind: input, shape index: {}]   ;;  %s381_s0 = inlined_call_operand.vmem [shape: f32[128,8], index: 0, kind: input, shape index: {}]   ;;  %s382_s2 = inlined_call_operand.vmem [shape: f32[1,24], index: 2, kind: input, shape index: {}]   ;;  %s383_s3 = inlined_call_operand.vmem [shape: f32[128,24], index: 3, kind: output, shape index: {}]  }
   0x1   :  { %v39_v0 = vld [vmem:[%s380_s1] sm:$0xf]  ;;  %v16_v2 = vld [vmem:[%s381_s0 + $0x8] sm:$0xff]  ;;  %v17_v7 = vld [vmem:[%s381_s0 + $0x10] sm:$0xff] }
   0x2   :  { %v15_v1 = vld [vmem:[%s381_s0] sm:$0xff]  ;;  %232 = vmatprep.subr.msk.bf16.mxu0 %vm72_vm0, %v39_v0  ;;  %233 = vmatprep.subr.msk.bf16.mxu1 %vm72_vm0, %v39_v0  ;;  %v74_v3 = vsel %vm72_vm0, %v39_v0, 0  ;;  %v24_v6 = vld [vmem:[%s381_s0 + $0x48] sm:$0xff]  ;;  %v18_v9 = vld [vmem:[%s381_s0 + $0x18] sm:$0xff] }
   0x3   :  { %v31_v4 = vpack.c.bf16 %v16_v2, %v15_v1  ;;  %v23_v5 = vld [vmem:[%s381_s0 + $0x40] sm:$0xff]  ;;  %213 = vmatpush3.bf16.msra.mxu0 %v74_v3  ;;  %231 = vmatpush3.bf16.msra.mxu1 %v74_v3  ;;  %v25_v10 = vld [vmem:[%s381_s0 + $0x50] sm:$0xff]  ;;  %v26_v11 = vld [vmem:[%s381_s0 + $0x58] sm:$0xff]  ;;  %v32_v12 = vpack.c.bf16 %v18_v9, %v17_v7 }
   0x4   :  { %v35_v8 = vpack.c.bf16 %v24_v6, %v23_v5  ;;  %v36_v13 = vpack.c.bf16 %v26_v11, %v25_v10  ;;  %v19_v14 = vld [vmem:[%s381_s0 + $0x20] sm:$0xff]  ;;  %v20_v15 = vld [vmem:[%s381_s0 + $0x28] sm:$0xff]  ;;  %v21_v20 = vld [vmem:[%s381_s0 + $0x30] sm:$0xff] }
   0x5   :  { %214 = vmatprep.mubr.msk.bf16.mxu0 %vm47_vm1, %v31_v4  ;;  %v27_v16 = vld [vmem:[%s381_s0 + $0x60] sm:$0xff]  ;;  %v33_v17 = vpack.c.bf16 %v20_v15, %v19_v14  ;;  %v28_v18 = vld [vmem:[%s381_s0 + $0x68] sm:$0xff]  ;;  %v22_v21 = vld [vmem:[%s381_s0 + $0x38] sm:$0xff] }
   0x6   :  { %222 = vmatprep.mubr.msk.bf16.mxu1 %vm47_vm1, %v35_v8  ;;  %215 = vmatmul.mubr.msk.bf16.vlgmr.msra.gmra.mrb[0].mxu0 %vm47_vm1, %v32_v12  ;;  %v37_v19 = vpack.c.bf16 %v28_v18, %v27_v16  ;;  %v29_v22 = vld [vmem:[%s381_s0 + $0x70] sm:$0xff]  ;;  %v30_v23 = vld [vmem:[%s381_s0 + $0x78] sm:$0xff]  ;;  %v34_v24 = vpack.c.bf16 %v22_v21, %v21_v20  ;;  %v194_v26 = vld [vmem:[%s382_s2] ss:$0 sm:$0xff] }
   0x7   :  { %223 = vmatmul.mubr.msk.bf16.vlgmr.msra.gmra.mrb[0].mxu1 %vm47_vm1, %v36_v13  ;;  %218 = vmatprep.mubr.msk.bf16.mxu0 %vm47_vm1, %v33_v17  ;;  %v38_v25 = vpack.c.bf16 %v30_v23, %v29_v22 }
   0x8   :  { %226 = vmatprep.mubr.msk.bf16.mxu1 %vm47_vm1, %v37_v19 }
   0xe   :  { %219 = vmatmul.mubr.msk.bf16.gmra.mrb[4].mxu0 %vm47_vm1, %v34_v24 }
   0xf   :  { %227 = vmatmul.mubr.msk.bf16.gmra.mrb[4].mxu1 %vm47_vm1, %v38_v25 }
  0xd9   :  { %v216_v27 = vpop.f32.mrb[0].mxu0 }
  0xda   :  { %v224_v28 = vpop.f32.mrb[0].mxu1  ;;  %v119_v29 = vadd.f32 %v216_v27, %v194_v26  ;;  %v110_v31 = vpop.f32.mrb[1].mxu0 }
  0xdb   :  { %v151_v30 = vadd.f32 %v224_v28, %v194_v26  ;;  %v142_v32 = vpop.f32.mrb[1].mxu1  ;;  %v111_v33 = vadd.f32 %v194_v26, %v110_v31  ;;  %v217_v35 = vpop.f32.mrb[2].mxu0 }
  0xdc   :  { %v143_v34 = vadd.f32 %v194_v26, %v142_v32  ;;  %v225_v36 = vpop.f32.mrb[2].mxu1  ;;  %176 = vst.msk [vmem:[%s383_s3 + $0x10] sm:$0xff] %vm173_vm2, %v119_v29  ;;  %v122_v37 = vadd.f32 %v217_v35, %v194_v26  ;;  %v113_v39 = vpop.f32.mrb[3].mxu0 }
  0xdd   :  { %184 = vst.msk [vmem:[%s383_s3 + $0x50] sm:$0xff] %vm173_vm2, %v151_v30  ;;  %v154_v38 = vadd.f32 %v225_v36, %v194_v26  ;;  %v145_v40 = vpop.f32.mrb[3].mxu1  ;;  %174 = vst.msk [vmem:[%s383_s3] sm:$0xff] %vm173_vm2, %v111_v33  ;;  %v114_v41 = vadd.f32 %v194_v26, %v113_v39 }
  0xde   :  { %182 = vst.msk [vmem:[%s383_s3 + $0x40] sm:$0xff] %vm173_vm2, %v143_v34  ;;  %v146_v42 = vadd.f32 %v194_v26, %v145_v40  ;;  %177 = vst.msk [vmem:[%s383_s3 + $0x18] sm:$0xff] %vm173_vm2, %v122_v37 }
  0xdf   :  { %185 = vst.msk [vmem:[%s383_s3 + $0x58] sm:$0xff] %vm173_vm2, %v154_v38  ;;  %175 = vst.msk [vmem:[%s383_s3 + $0x8] sm:$0xff] %vm173_vm2, %v114_v41 }
  0xe0   :  { %183 = vst.msk [vmem:[%s383_s3 + $0x48] sm:$0xff] %vm173_vm2, %v146_v42 }
  0xe1   :  { %v220_v43 = vpop.f32.mrb[4].mxu0 }
  0xe2   :  { %v228_v44 = vpop.f32.mrb[4].mxu1  ;;  %v135_v45 = vadd.f32 %v220_v43, %v194_v26  ;;  %v126_v47 = vpop.f32.mrb[5].mxu0 }
  0xe3   :  { %v167_v46 = vadd.f32 %v228_v44, %v194_v26  ;;  %v158_v48 = vpop.f32.mrb[5].mxu1  ;;  %v127_v49 = vadd.f32 %v194_v26, %v126_v47  ;;  %v221_v51 = vpop.f32.mrb[6].mxu0 }
  0xe4   :  { %v159_v50 = vadd.f32 %v194_v26, %v158_v48  ;;  %v229_v52 = vpop.f32.mrb[6].mxu1  ;;  %180 = vst.msk [vmem:[%s383_s3 + $0x30] sm:$0xff] %vm173_vm2, %v135_v45  ;;  %v138_v53 = vadd.f32 %v221_v51, %v194_v26  ;;  %v129_v55 = vpop.f32.mrb[7].mxu0 }
  0xe5   :  { %188 = vst.msk [vmem:[%s383_s3 + $0x70] sm:$0xff] %vm173_vm2, %v167_v46  ;;  %v170_v54 = vadd.f32 %v229_v52, %v194_v26  ;;  %v161_v56 = vpop.f32.mrb[7].mxu1  ;;  %178 = vst.msk [vmem:[%s383_s3 + $0x20] sm:$0xff] %vm173_vm2, %v127_v49  ;;  %v130_v57 = vadd.f32 %v194_v26, %v129_v55 }
  0xe6   :  { %186 = vst.msk [vmem:[%s383_s3 + $0x60] sm:$0xff] %vm173_vm2, %v159_v50  ;;  %v162_v58 = vadd.f32 %v194_v26, %v161_v56  ;;  %181 = vst.msk [vmem:[%s383_s3 + $0x38] sm:$0xff] %vm173_vm2, %v138_v53 }
  0xe7   :  { %189 = vst.msk [vmem:[%s383_s3 + $0x78] sm:$0xff] %vm173_vm2, %v170_v54  ;;  %179 = vst.msk [vmem:[%s383_s3 + $0x28] sm:$0xff] %vm173_vm2, %v130_v57 }
  0xe8   :  { %187 = vst.msk [vmem:[%s383_s3 + $0x68] sm:$0xff] %vm173_vm2, %v162_v58 }

</bundles_post_ra>
